<compile_context>
chip_gen: v7x
topology: tpu7x:2x2x1
jax: 0.10.0
libtpu: 0.0.40
codegen_flags: <defaults>
</compile_context>

<pallas_src>
import jax
import jax.numpy as jnp
from jax.experimental import pallas as pl
from jax.experimental.pallas import tpu as pltpu

IN_DIM = 704      # fc1 input features (unpadded; block dim == full array dim is legal)
HID = 64          # fc1 / fc2 output features
HID_PAD = 128     # 64 -> 128 lane-dense (zero padding is numerically exact)
OUT_DIM = 128     # output classes

MAX_TB = 2048     # max batch-tile rows per grid step (multiple of 8)


def _round_up(n, m):
    return ((n + m - 1) // m) * m


def _is_v7x():
    try:
        kind = jax.devices()[0].device_kind.lower()
    except Exception:
        return False
    return ("v7" in kind) or ("7x" in kind)


_IS_V7X = _is_v7x()
_MIN_TILES = 2 if _IS_V7X else 1      # give each v7x TensorCore its own tile(s)


def rl_l2_kernel(x_ref, w1_ref, b1_ref, w2_ref, b2_ref, w3_ref, b3_ref, o_ref):
    # fc1: in-kernel f32->bf16 cast of x (free under DMA/MXU), bf16 MXU matmul,
    # f32 accumulate; sigmoid in tanh form (single EUP op, f32).
    x = x_ref[...].astype(jnp.bfloat16)
    h1 = jnp.dot(x, w1_ref[...], preferred_element_type=jnp.float32)
    h1 = 0.5 * jnp.tanh(0.5 * (h1 + b1_ref[...])) + 0.5
    # TODO(synk): Dropout(p=0.3) is identity here (eval/inference mode only).

    # fc2 + sigmoid (bf16 MXU matmul on the VMEM-resident 128x128 weight).
    h2 = jnp.dot(h1.astype(jnp.bfloat16), w2_ref[...],
                 preferred_element_type=jnp.float32)
    h2 = 0.5 * jnp.tanh(0.5 * (h2 + b2_ref[...])) + 0.5

    # out + softmax over the 128 classes (dim=1).  Exact f32 divide so rows sum
    # to 1 to f32 precision (safe if the output feeds sampling / log-probs).
    logits = jnp.dot(h2.astype(jnp.bfloat16), w3_ref[...],
                     preferred_element_type=jnp.float32) + b3_ref[...]
    m = jnp.max(logits, axis=-1, keepdims=True)
    e = jnp.exp(logits - m)
    denom = jnp.sum(e, axis=-1, keepdims=True)
    o_ref[...] = (e / denom).astype(o_ref.dtype)


@jax.jit
def rl_l2_forward(x, w1p, b1p, w2p, b2p, w3p, b3p):
    """x: (B, 704) f32 (unpadded).  Padded params from pad_params().  -> (B, 128) f32."""
    b_orig = x.shape[0]

    if b_orig % 8 != 0 and b_orig > MAX_TB:
        # Rare path: batch too big for one full-extent tile and not sublane-aligned
        # -> pad up to a multiple of 8 rows (only case that still copies x).
        x = jnp.pad(x, ((0, _round_up(b_orig, 8) - b_orig), (0, 0)))
    B = x.shape[0]

    if B % 8 == 0:
        tb = min(MAX_TB, _round_up(-(-B // _MIN_TILES), 8))
    else:
        tb = B            # single full-extent tile (block dim == array dim is legal)
    grid = pl.cdiv(B, tb)  # partial last block is masked by Pallas

    if _IS_V7X and grid >= 2:
        dim_sem = (getattr(pltpu, "CORE_PARALLEL", "parallel"),)  # split across the 2 TCs
    else:
        dim_sem = ("parallel",)

    out = pl.pallas_call(
        rl_l2_kernel,
        out_shape=jax.ShapeDtypeStruct((B, OUT_DIM), jnp.float32),
        grid=(grid,),
        in_specs=[
            pl.BlockSpec((tb, IN_DIM), lambda i: (i, 0)),        # x tile (pipelined, f32)
            pl.BlockSpec((IN_DIM, HID_PAD), lambda i: (0, 0)),   # w1 (resident, bf16)
            pl.BlockSpec((1, HID_PAD), lambda i: (0, 0)),        # b1 (f32)
            pl.BlockSpec((HID_PAD, HID_PAD), lambda i: (0, 0)),  # w2 (bf16)
            pl.BlockSpec((1, HID_PAD), lambda i: (0, 0)),        # b2 (f32)
            pl.BlockSpec((HID_PAD, OUT_DIM), lambda i: (0, 0)),  # w3 (bf16)
            pl.BlockSpec((1, OUT_DIM), lambda i: (0, 0)),        # b3 (f32)
        ],
        out_specs=pl.BlockSpec((tb, OUT_DIM), lambda i: (i, 0)),
        compiler_params=pltpu.CompilerParams(
            dimension_semantics=dim_sem,
            vmem_limit_bytes=32 * 1024 * 1024,   # ~20 MiB in use at tb=2048
        ),
    )(x, w1p, b1p, w2p, b2p, w3p, b3p)

    if B != b_orig:
        out = out[:b_orig]
    return out


def init_params(key):
    """Unpadded f32 params; weights stored as (in, out) = transpose of torch Linear."""
    k1, k2, k3, k4, k5, k6 = jax.random.split(key, 6)
    w1 = jax.random.normal(k1, (IN_DIM, HID), jnp.float32) * (1.0 / jnp.sqrt(IN_DIM))
    b1 = jax.random.normal(k2, (1, HID), jnp.float32) * 0.01
    w2 = jax.random.normal(k3, (HID, HID), jnp.float32) * (1.0 / jnp.sqrt(HID))
    b2 = jax.random.normal(k4, (1, HID), jnp.float32) * 0.01
    w3 = jax.random.normal(k5, (HID, OUT_DIM), jnp.float32) * (1.0 / jnp.sqrt(HID))
    b3 = jax.random.normal(k6, (1, OUT_DIM), jnp.float32) * 0.01
    return w1, b1, w2, b2, w3, b3


def pad_params(w1, b1, w2, b2, w3, b3):
    """Zero-pad hidden dims 64 -> 128 (numerically exact) and cast weights to bf16.

    Exactness: pad hidden lanes get sigmoid(0 + 0) = 0.5, which then multiplies
    zero-padded rows of the next weight -> contributes nothing to the result.
    """
    w1p = jnp.zeros((IN_DIM, HID_PAD), jnp.bfloat16).at[:, :HID].set(
        w1.astype(jnp.bfloat16))
    b1p = jnp.zeros((1, HID_PAD), jnp.float32).at[:, :HID].set(b1)
    w2p = jnp.zeros((HID_PAD, HID_PAD), jnp.bfloat16).at[:HID, :HID].set(
        w2.astype(jnp.bfloat16))
    b2p = jnp.zeros((1, HID_PAD), jnp.float32).at[:, :HID].set(b2)
    w3p = jnp.zeros((HID_PAD, OUT_DIM), jnp.bfloat16).at[:HID, :].set(
        w3.astype(jnp.bfloat16))
    b3p = b3.astype(jnp.float32)     # already (1, 128)
    return w1p, b1p, w2p, b2p, w3p, b3p


def reference(x, w1, b1, w2, b2, w3, b3):
    h1 = jax.nn.sigmoid(x @ w1 + b1)
    h2 = jax.nn.sigmoid(h1 @ w2 + b2)
    return jax.nn.softmax(h2 @ w3 + b3, axis=1)


if __name__ == "__main__":
    key = jax.random.PRNGKey(0)
    kx, kp = jax.random.split(key)
    B = 16
    x = jax.random.normal(kx, (B, IN_DIM), jnp.float32)
    params = init_params(kp)
    padded = pad_params(*params)

    out = rl_l2_forward(x, *padded)
    out = jax.block_until_ready(out)
    ref = reference(x, *params)

    assert out.shape == (B, OUT_DIM)
    # bf16 MXU matmuls -> relaxed tolerance vs the pure-f32 reference.
    assert jnp.allclose(out, ref, atol=2e-3, rtol=2e-2), "mismatch vs reference"
    # Exact f32 softmax divide: rows sum to 1 to f32 precision.
    assert jnp.allclose(jnp.sum(out, axis=1), 1.0, atol=1e-4), "softmax rows must sum to 1"

    print("KERNEL_OK")
</pallas_src>

<mosaic_0001>
module attributes {stable_mosaic.version = 11 : i64} {
  func.func @rl_l2_kernel(%arg0: i32, %arg1: memref<16x704xf32, #tpu.memory_space<vmem>>, %arg2: memref<704x128xbf16, #tpu.memory_space<vmem>>, %arg3: memref<1x128xf32, #tpu.memory_space<vmem>>, %arg4: memref<128x128xbf16, #tpu.memory_space<vmem>>, %arg5: memref<1x128xf32, #tpu.memory_space<vmem>>, %arg6: memref<128x128xbf16, #tpu.memory_space<vmem>>, %arg7: memref<1x128xf32, #tpu.memory_space<vmem>>, %arg8: memref<16x128xf32, #tpu.memory_space<vmem>>) attributes {dimension_semantics = [#tpu.dimension_semantics<parallel>], iteration_bounds = array<i64: 1>, scalar_prefetch = 0 : i64, scratch_operands = 0 : i64, tpu.core_type = #tpu.core_type<tc>, window_params = [{transform_indices = @transform_0, window_bounds = array<i64: 16, 704>}, {pipeline_mode = #tpu.pipeline_mode<synchronous>, transform_indices = @transform_1, window_bounds = array<i64: 704, 128>}, {pipeline_mode = #tpu.pipeline_mode<synchronous>, transform_indices = @transform_2, window_bounds = array<i64: 1, 128>}, {pipeline_mode = #tpu.pipeline_mode<synchronous>, transform_indices = @transform_3, window_bounds = array<i64: 128, 128>}, {pipeline_mode = #tpu.pipeline_mode<synchronous>, transform_indices = @transform_4, window_bounds = array<i64: 1, 128>}, {pipeline_mode = #tpu.pipeline_mode<synchronous>, transform_indices = @transform_5, window_bounds = array<i64: 128, 128>}, {pipeline_mode = #tpu.pipeline_mode<synchronous>, transform_indices = @transform_6, window_bounds = array<i64: 1, 128>}, {transform_indices = @transform_7, window_bounds = array<i64: 16, 128>}]} {
    %c0 = arith.constant 0 : index
    %c0_0 = arith.constant 0 : index
    %0 = vector.load %arg1[%c0, %c0_0] : memref<16x704xf32, #tpu.memory_space<vmem>>, vector<16x704xf32>
    %1 = arith.truncf %0 : vector<16x704xf32> to vector<16x704xbf16>
    %c0_1 = arith.constant 0 : index
    %c0_2 = arith.constant 0 : index
    %2 = vector.load %arg2[%c0_1, %c0_2] : memref<704x128xbf16, #tpu.memory_space<vmem>>, vector<704x128xbf16>
    %cst = arith.constant dense<0.000000e+00> : vector<16x128xf32>
    %3 = tpu.matmul %1, %2, %cst {dimension_numbers = #tpu.dot_dimension_numbers<[1], [0], [0], [1], [0, 0, 1, 1], [], []>} : vector<16x704xbf16>, vector<704x128xbf16>, vector<16x128xf32> -> vector<16x128xf32>
    %c0_3 = arith.constant 0 : index
    %c0_4 = arith.constant 0 : index
    %4 = vector.load %arg3[%c0_3, %c0_4] : memref<1x128xf32, #tpu.memory_space<vmem>>, vector<1x128xf32>
    %5 = vector.broadcast %4 : vector<1x128xf32> to vector<16x128xf32>
    %6 = arith.addf %3, %5 : vector<16x128xf32>
    %cst_5 = arith.constant 5.000000e-01 : f32
    %7 = vector.broadcast %cst_5 : f32 to vector<16x128xf32>
    %8 = arith.mulf %7, %6 : vector<16x128xf32>
    %9 = math.tanh %8 : vector<16x128xf32>
    %cst_6 = arith.constant 5.000000e-01 : f32
    %10 = vector.broadcast %cst_6 : f32 to vector<16x128xf32>
    %11 = arith.mulf %10, %9 : vector<16x128xf32>
    %cst_7 = arith.constant 5.000000e-01 : f32
    %12 = vector.broadcast %cst_7 : f32 to vector<16x128xf32>
    %13 = arith.addf %11, %12 : vector<16x128xf32>
    %14 = arith.truncf %13 : vector<16x128xf32> to vector<16x128xbf16>
    %c0_8 = arith.constant 0 : index
    %c0_9 = arith.constant 0 : index
    %15 = vector.load %arg4[%c0_8, %c0_9] : memref<128x128xbf16, #tpu.memory_space<vmem>>, vector<128x128xbf16>
    %cst_10 = arith.constant dense<0.000000e+00> : vector<16x128xf32>
    %16 = tpu.matmul %14, %15, %cst_10 {dimension_numbers = #tpu.dot_dimension_numbers<[1], [0], [0], [1], [0, 0, 1, 1], [], []>} : vector<16x128xbf16>, vector<128x128xbf16>, vector<16x128xf32> -> vector<16x128xf32>
    %c0_11 = arith.constant 0 : index
    %c0_12 = arith.constant 0 : index
    %17 = vector.load %arg5[%c0_11, %c0_12] : memref<1x128xf32, #tpu.memory_space<vmem>>, vector<1x128xf32>
    %18 = vector.broadcast %17 : vector<1x128xf32> to vector<16x128xf32>
    %19 = arith.addf %16, %18 : vector<16x128xf32>
    %cst_13 = arith.constant 5.000000e-01 : f32
    %20 = vector.broadcast %cst_13 : f32 to vector<16x128xf32>
    %21 = arith.mulf %20, %19 : vector<16x128xf32>
    %22 = math.tanh %21 : vector<16x128xf32>
    %cst_14 = arith.constant 5.000000e-01 : f32
    %23 = vector.broadcast %cst_14 : f32 to vector<16x128xf32>
    %24 = arith.mulf %23, %22 : vector<16x128xf32>
    %cst_15 = arith.constant 5.000000e-01 : f32
    %25 = vector.broadcast %cst_15 : f32 to vector<16x128xf32>
    %26 = arith.addf %24, %25 : vector<16x128xf32>
    %27 = arith.truncf %26 : vector<16x128xf32> to vector<16x128xbf16>
    %c0_16 = arith.constant 0 : index
    %c0_17 = arith.constant 0 : index
    %28 = vector.load %arg6[%c0_16, %c0_17] : memref<128x128xbf16, #tpu.memory_space<vmem>>, vector<128x128xbf16>
    %cst_18 = arith.constant dense<0.000000e+00> : vector<16x128xf32>
    %29 = tpu.matmul %27, %28, %cst_18 {dimension_numbers = #tpu.dot_dimension_numbers<[1], [0], [0], [1], [0, 0, 1, 1], [], []>} : vector<16x128xbf16>, vector<128x128xbf16>, vector<16x128xf32> -> vector<16x128xf32>
    %c0_19 = arith.constant 0 : index
    %c0_20 = arith.constant 0 : index
    %30 = vector.load %arg7[%c0_19, %c0_20] : memref<1x128xf32, #tpu.memory_space<vmem>>, vector<1x128xf32>
    %31 = vector.broadcast %30 : vector<1x128xf32> to vector<16x128xf32>
    %32 = arith.addf %29, %31 : vector<16x128xf32>
    %cst_21 = arith.constant dense<0xFF800000> : vector<16xf32>
    %33 = vector.multi_reduction <maximumf>, %32, %cst_21 [1] : vector<16x128xf32> to vector<16xf32>
    %34 = vector.shape_cast %33 : vector<16xf32> to vector<16x1xf32>
    %35 = vector.broadcast %34 : vector<16x1xf32> to vector<16x128xf32>
    %36 = arith.subf %32, %35 : vector<16x128xf32>
    %37 = math.exp %36 : vector<16x128xf32>
    %cst_22 = arith.constant dense<0.000000e+00> : vector<16xf32>
    %38 = vector.multi_reduction <add>, %37, %cst_22 [1] : vector<16x128xf32> to vector<16xf32>
    %39 = vector.shape_cast %38 : vector<16xf32> to vector<16x1xf32>
    %40 = vector.broadcast %39 : vector<16x1xf32> to vector<16x128xf32>
    %41 = arith.divf %37, %40 : vector<16x128xf32>
    %c0_23 = arith.constant 0 : index
    %c0_24 = arith.constant 0 : index
    %42 = vector.load %arg8[%c0_23, %c0_24] : memref<16x128xf32, #tpu.memory_space<vmem>>, vector<16x128xf32>
    tpu.vector_store %arg8[%c0_23, %c0_24], %41 {strides = array<i32>} : memref<16x128xf32, #tpu.memory_space<vmem>>, vector<16x128xf32>,
    return
  }
  func.func @transform_0(%arg0: i32) -> (i32, i32) {
    %c0_i32 = arith.constant 0 : i32
    %c0_i32_0 = arith.constant 0 : i32
    return %arg0, %c0_i32 : i32, i32
  }
  func.func @transform_1(%arg0: i32) -> (i32, i32) {
    %c0_i32 = arith.constant 0 : i32
    %c0_i32_0 = arith.constant 0 : i32
    %c0_i32_1 = arith.constant 0 : i32
    return %c0_i32, %c0_i32_0 : i32, i32
  }
  func.func @transform_2(%arg0: i32) -> (i32, i32) {
    %c0_i32 = arith.constant 0 : i32
    %c0_i32_0 = arith.constant 0 : i32
    %c0_i32_1 = arith.constant 0 : i32
    return %c0_i32, %c0_i32_0 : i32, i32
  }
  func.func @transform_3(%arg0: i32) -> (i32, i32) {
    %c0_i32 = arith.constant 0 : i32
    %c0_i32_0 = arith.constant 0 : i32
    %c0_i32_1 = arith.constant 0 : i32
    return %c0_i32, %c0_i32_0 : i32, i32
  }
  func.func @transform_4(%arg0: i32) -> (i32, i32) {
    %c0_i32 = arith.constant 0 : i32
    %c0_i32_0 = arith.constant 0 : i32
    %c0_i32_1 = arith.constant 0 : i32
    return %c0_i32, %c0_i32_0 : i32, i32
  }
  func.func @transform_5(%arg0: i32) -> (i32, i32) {
    %c0_i32 = arith.constant 0 : i32
    %c0_i32_0 = arith.constant 0 : i32
    %c0_i32_1 = arith.constant 0 : i32
    return %c0_i32, %c0_i32_0 : i32, i32
  }
  func.func @transform_6(%arg0: i32) -> (i32, i32) {
    %c0_i32 = arith.constant 0 : i32
    %c0_i32_0 = arith.constant 0 : i32
    %c0_i32_1 = arith.constant 0 : i32
    return %c0_i32, %c0_i32_0 : i32, i32
  }
  func.func @transform_7(%arg0: i32) -> (i32, i32) {
    %c0_i32 = arith.constant 0 : i32
    %c0_i32_0 = arith.constant 0 : i32
    return %arg0, %c0_i32 : i32, i32
  }
}

</mosaic_0001>

<bundles_post_ra>
// kernel: rl_l2_forward.1
= control target key start
LH: loop header
LB: loop body
LE: loop exit
PB: predicated region body
PF: predicated region fallthrough
CT: control target
= control target key end

     0   :  { %12 = vsyncpa [#allocation3], 0  ;;  %s1401_s0 = inlined_call_operand.hbm [shape: f32[16,704], index: 0, kind: input, shape index: {}]   ;;  %s1402_s1 = inlined_call_operand.hbm [shape: bf16[704,128], index: 1, kind: input, shape index: {}]   ;;  %s1403_s2 = inlined_call_operand.vmem [shape: f32[1,128], index: 2, kind: input, shape index: {}]   ;;  %s1404_s3 = inlined_call_operand.hbm [shape: bf16[128,128], index: 3, kind: input, shape index: {}]   ;;  %s1405_s4 = inlined_call_operand.vmem [shape: f32[1,128], index: 4, kind: input, shape index: {}]   ;;  %s1406_s5 = inlined_call_operand.hbm [shape: bf16[128,128], index: 5, kind: input, shape index: {}]   ;;  %s1407_s6 = inlined_call_operand.vmem [shape: f32[1,128], index: 6, kind: input, shape index: {}]   ;;  %s1408_s7 = inlined_call_operand.hbm [shape: f32[16,128], index: 7, kind: output, shape index: {}]  }
   0x1   :  { %13 = vsyncpa [#allocation6], 0 }
   0x2   :  { %14 = vsyncpa [#allocation9], 0 }
   0x3   :  { %15 = vsyncpa [#allocation4], 0  ;;  %s1242_s24 = smov [#allocation5]   ;;  %s1124_s28 = scalar_lea.hbm %s1402_s1, 5632 }
   0x4   :  { %s33_s25 = sshll.u32 %s1242_s24, 4  ;;  %p1125_p0 = scmp.ne.s32.totalorder %s1402_s1, %s1124_s28  ;;  %s34_s25 = int_to_ptr.vmem [resolvable:$true] %s33_s25 }
   0x5   :  { %p1128_p1 = scmp.lt.u32.totalorder %s1124_s28, %s1402_s1 }
   0x7   :  { %p1130_p2 = pnand %p1128_p1, %p1125_p0 }
   0x9   :  { %1133 = shalt.err (!%p1130_p2)
}
   0xa   :  { %s1134_s10 = scalar_lea.vmem %s34_s25, 5632  ;;  %p1139_p4 = scmp.lt.s32.totalorder %s34_s25, %s34_s25 }
   0xb   :  { %p1135_p3 = scmp.ne.s32.totalorder %s34_s25, %s1134_s10  ;;  %p1140_p5 = scmp.lt.s32.totalorder %s1134_s10, %s1134_s10 }
   0xd   :  { %p1141_p6 = por %p1140_p5, %p1139_p4 }
   0xf   :  { %p1142_p7 = pnand %p1141_p6, %p1135_p3 }
  0x11   :  { %1145 = shalt.err (!%p1142_p7)
}
  0x12   :  { %s1243_s11 = smov 64   ;;  %s1244_s12 = smov 4  }
  0x13   :  { %39 = dma.hbm_to_vmem [thread:$0]  %s1402_s1, 5632, %s34_s25, [#allocation6], %s1243_s11, %s1243_s11, %s1244_s12  }
  0x14   :  { %s1245_s15 = smov [#allocation2]   ;;  %s1146_s19 = scalar_lea.hbm %s1401_s0, 1536 }
  0x15   :  { %s21_s16 = sshll.u32 %s1245_s15, 4  ;;  %p1147_p8 = scmp.ne.s32.totalorder %s1401_s0, %s1146_s19  ;;  %s22_s16 = int_to_ptr.vmem [resolvable:$true] %s21_s16 }
  0x16   :  { %p1150_p9 = scmp.lt.u32.totalorder %s1146_s19, %s1401_s0 }
  0x18   :  { %p1152_p10 = pnand %p1150_p9, %p1147_p8 }
  0x1a   :  { %1155 = shalt.err (!%p1152_p10)
}
  0x1b   :  { %s1156_s24 = scalar_lea.vmem %s22_s16, 1536  ;;  %p1161_p12 = scmp.lt.s32.totalorder %s22_s16, %s22_s16 }
  0x1c   :  { %p1157_p11 = scmp.ne.s32.totalorder %s22_s16, %s1156_s24  ;;  %p1162_p13 = scmp.lt.s32.totalorder %s1156_s24, %s1156_s24 }
  0x1e   :  { %p1163_p0 = por %p1162_p13, %p1161_p12 }
  0x20   :  { %p1164_p1 = pnand %p1163_p0, %p1157_p11 }
  0x22   :  { %1167 = shalt.err (!%p1164_p1)
}
  0x23   :  { %s1246_s1 = smov 768   ;;  %s1247_s25 = smov 48  }
  0x24   :  { %27 = dma.hbm_to_vmem [thread:$0]  %s1401_s0, 1536, %s22_s16, [#allocation3], %s1246_s1, %s1246_s1, %s1247_s25  }
  0x25   :  { %s1248_s28 = smov [#allocation7]   ;;  %s1249_s30 = smov [#allocation8]  }
  0x26   :  { %s47_s29 = sshll.u32 %s1248_s28, 4  ;;  %s61_s8 = sshll.u32 %s1249_s30, 4  ;;  %s48_s29 = int_to_ptr.vmem [resolvable:$true] %s47_s29  ;;  %s1323_s8 = int_to_ptr.vmem [resolvable:$true] %s61_s8 }
  0x27   :  { %s1168_s13 = scalar_lea.hbm %s1404_s3, 1024 }
  0x28   :  { %p1169_p2 = scmp.ne.s32.totalorder %s1404_s3, %s1168_s13  ;;  %p1172_p3 = scmp.lt.u32.totalorder %s1168_s13, %s1404_s3 }
  0x2a   :  { %p1174_p4 = pnand %p1172_p3, %p1169_p2 }
  0x2c   :  { %1177 = shalt.err (!%p1174_p4)
}
  0x2d   :  { %s1178_s0 = scalar_lea.vmem %s48_s29, 1024  ;;  %p1183_p6 = scmp.lt.s32.totalorder %s48_s29, %s48_s29 }
  0x2e   :  { %p1179_p5 = scmp.ne.s32.totalorder %s48_s29, %s1178_s0  ;;  %p1184_p7 = scmp.lt.s32.totalorder %s1178_s0, %s1178_s0 }
  0x30   :  { %p1185_p8 = por %p1184_p7, %p1183_p6 }
  0x32   :  { %p1186_p9 = pnand %p1185_p8, %p1179_p5 }
  0x34   :  { %1189 = shalt.err (!%p1186_p9)
}
  0x35   :  { %53 = dma.hbm_to_vmem [thread:$0]  %s1404_s3, 1024, %s48_s29, [#allocation6], %s1243_s11, %s1243_s11, %s1244_s12  }
  0x36   :  { %s1190_s22 = scalar_lea.hbm %s1406_s5, 1024 }
  0x37   :  { %p1191_p10 = scmp.ne.s32.totalorder %s1406_s5, %s1190_s22  ;;  %p1194_p11 = scmp.lt.u32.totalorder %s1190_s22, %s1406_s5 }
  0x39   :  { %p1196_p12 = pnand %p1194_p11, %p1191_p10 }
  0x3b   :  { %1199 = shalt.err (!%p1196_p12)
}
  0x3c   :  { %s1200_s26 = scalar_lea.vmem %s1323_s8, 1024  ;;  %p1205_p0 = scmp.lt.s32.totalorder %s1323_s8, %s1323_s8 }
  0x3d   :  { %p1201_p13 = scmp.ne.s32.totalorder %s1323_s8, %s1200_s26  ;;  %p1206_p1 = scmp.lt.s32.totalorder %s1200_s26, %s1200_s26 }
  0x3f   :  { %p1207_p2 = por %p1206_p1, %p1205_p0 }
  0x41   :  { %p1208_p3 = pnand %p1207_p2, %p1201_p13 }
  0x43   :  { %1211 = shalt.err (!%p1208_p3)
}
  0x44   :  { %67 = dma.hbm_to_vmem [thread:$0]  %s1406_s5, 1024, %s1323_s8, [#allocation9], %s1243_s11, %s1243_s11, %s1244_s12  }
  0x45   :  { %1234 = dma.done.wait [#allocation3], 1536  }
  0x46   :  { %1235 = vsyncadd [#allocation3], 4294965760 }
  0x47   :  { %1236 = dma.done.wait [#allocation6], 6656  }
  0x48   :  { %1237 = vsyncadd [#allocation6], 4294960640 }
  0x49   :  { %1238 = dma.done.wait [#allocation9], 1024  }
  0x4a   :  { %1239 = vsyncadd [#allocation9], 4294966272  ;;  %v1048_v0 = vld [vmem:[#allocation5 + $0x40] sm:$0xff]   ;;  %v1052_v4 = vld [vmem:[#allocation5 + $0x48] sm:$0xff]   ;;  %v1250_v36 = vmov 0   ;;  %vm460_vm0 = vcmask 523264  }
  0x4b   :  { %v1049_v1 = vld [vmem:[#allocation5] sm:$0xff]   ;;  %932 = vmatprep.subr.bf16.mxu0 %v1048_v0  ;;  %v1053_v5 = vld [vmem:[#allocation5 + $0x8] sm:$0xff]   ;;  %v1056_v8 = vld [vmem:[#allocation5 + $0x50] sm:$0xff]   ;;  %v1251_v0 = vmov 0.0   ;;  %vm1252_vm1 = vmmov 0  }
  0x4c   :  { %v1050_v2 = vld [vmem:[#allocation5 + $0xc0] sm:$0xff]   ;;  %933 = vmatpush3.bf16.msra.mxu0 %v1049_v1  ;;  %v1054_v6 = vld [vmem:[#allocation5 + $0xc8] sm:$0xff]   ;;  %v1057_v9 = vld [vmem:[#allocation5 + $0x10] sm:$0xff]  }
  0x4d   :  { %v1051_v3 = vld [vmem:[#allocation5 + $0x80] sm:$0xff]   ;;  %954 = vmatprep.subr.bf16.mxu1 %v1050_v2  ;;  %934 = vmatprep.subr.bf16.mxu0 %v1052_v4  ;;  %v1055_v7 = vld [vmem:[#allocation5 + $0x88] sm:$0xff]   ;;  %v1058_v10 = vld [vmem:[#allocation5 + $0xd0] sm:$0xff]  }
  0x4e   :  { %955 = vmatpush3.bf16.msra.mxu1 %v1051_v3  ;;  %v1059_v11 = vld [vmem:[#allocation5 + $0x90] sm:$0xff]   ;;  %v1060_v12 = vld [vmem:[#allocation5 + $0x58] sm:$0xff]   ;;  %v1064_v16 = vld [vmem:[#allocation5 + $0x60] sm:$0xff]  }
  0x4f   :  { %956 = vmatprep.subr.bf16.mxu1 %v1054_v6  ;;  %v1061_v13 = vld [vmem:[#allocation5 + $0x18] sm:$0xff]   ;;  %v1065_v17 = vld [vmem:[#allocation5 + $0x20] sm:$0xff]   ;;  %v1068_v20 = vld [vmem:[#allocation5 + $0x68] sm:$0xff]  }
  0x50   :  { %935 = vmatpush3.bf16.msra.mxu0 %v1053_v5  ;;  %v1062_v14 = vld [vmem:[#allocation5 + $0xd8] sm:$0xff]   ;;  %v1066_v18 = vld [vmem:[#allocation5 + $0xe0] sm:$0xff]   ;;  %v1069_v21 = vld [vmem:[#allocation5 + $0x28] sm:$0xff]  }
  0x51   :  { %936 = vmatprep.subr.bf16.mxu0 %v1056_v8  ;;  %v1063_v15 = vld [vmem:[#allocation5 + $0x98] sm:$0xff]   ;;  %v1067_v19 = vld [vmem:[#allocation5 + $0xa0] sm:$0xff]   ;;  %v1070_v22 = vld [vmem:[#allocation5 + $0xe8] sm:$0xff]  }
  0x52   :  { %957 = vmatpush3.bf16.msra.mxu1 %v1055_v7  ;;  %v1071_v23 = vld [vmem:[#allocation5 + $0xa8] sm:$0xff]   ;;  %v1072_v24 = vld [vmem:[#allocation5 + $0x70] sm:$0xff]   ;;  %v1076_v28 = vld [vmem:[#allocation5 + $0x78] sm:$0xff]  }
  0x53   :  { %958 = vmatprep.subr.bf16.mxu1 %v1058_v10  ;;  %v1073_v25 = vld [vmem:[#allocation5 + $0x30] sm:$0xff]   ;;  %v1077_v29 = vld [vmem:[#allocation5 + $0x38] sm:$0xff]   ;;  %v84_v31 = vld [vmem:[#allocation2 + $0x8] sm:$0xff] }
  0x54   :  { %937 = vmatpush3.bf16.msra.mxu0 %v1057_v9  ;;  %v1074_v26 = vld [vmem:[#allocation5 + $0xf0] sm:$0xff]   ;;  %v1078_v30 = vld [vmem:[#allocation5 + $0xf8] sm:$0xff]   ;;  %v83_v35 = vld [vmem:[#allocation2] sm:$0xff] }
  0x55   :  { %938 = vmatprep.subr.bf16.mxu0 %v1060_v12  ;;  %v1075_v27 = vld [vmem:[#allocation5 + $0xb0] sm:$0xff]   ;;  %v90_v32 = vld [vmem:[#allocation2 + $0x38] sm:$0xff]  ;;  %v92_v39 = vld [vmem:[#allocation2 + $0x48] sm:$0xff] }
  0x56   :  { %959 = vmatpush3.bf16.msra.mxu1 %v1059_v11  ;;  %v96_v33 = vpack.c.bf16 %v90_v32, %v84_v31  ;;  %v1079_v34 = vld [vmem:[#allocation5 + $0xb8] sm:$0xff]   ;;  %v89_v37 = vld [vmem:[#allocation2 + $0x30] sm:$0xff]  ;;  %v1080_v42 = vld [vmem:[#allocation5 + $0x100] sm:$0xff]  }
  0x57   :  { %960 = vmatprep.subr.bf16.mxu1 %v1062_v14  ;;  %v86_v38 = vld [vmem:[#allocation2 + $0x18] sm:$0xff]  ;;  %v95_v40 = vpack.c.bf16 %v89_v37, %v83_v35  ;;  %v85_v43 = vld [vmem:[#allocation2 + $0x10] sm:$0xff]  ;;  %v91_v44 = vld [vmem:[#allocation2 + $0x40] sm:$0xff] }
  0x58   :  { %939 = vmatpush3.bf16.msra.mxu0 %v1061_v13  ;;  %496 = vmatprep.mubr.bf16.mxu0 %v96_v33  ;;  %v98_v41 = vpack.c.bf16 %v92_v39, %v86_v38  ;;  %v97_v45 = vpack.c.bf16 %v91_v44, %v85_v43  ;;  %v1081_v46 = vld [vmem:[#allocation5 + $0x108] sm:$0xff]   ;;  %v1082_v47 = vld [vmem:[#allocation5 + $0x110] sm:$0xff]   ;;  %v1083_v48 = vld [vmem:[#allocation5 + $0x118] sm:$0xff]  }
  0x59   :  { %940 = vmatprep.subr.bf16.mxu0 %v1064_v16  ;;  %v88_v49 = vld [vmem:[#allocation2 + $0x28] sm:$0xff]  ;;  %v1084_v50 = vld [vmem:[#allocation5 + $0x120] sm:$0xff]   ;;  %v94_v51 = vld [vmem:[#allocation2 + $0x58] sm:$0xff] }
  0x5a   :  { %961 = vmatpush3.bf16.msra.mxu1 %v1063_v15  ;;  %537 = vmatprep.mubr.bf16.mxu1 %v98_v41  ;;  %v100_v52 = vpack.c.bf16 %v94_v51, %v88_v49  ;;  %v1085_v53 = vld [vmem:[#allocation5 + $0x128] sm:$0xff]   ;;  %v1086_v54 = vld [vmem:[#allocation5 + $0x130] sm:$0xff]   ;;  %v1087_v55 = vld [vmem:[#allocation5 + $0x138] sm:$0xff]  }
  0x5b   :  { %962 = vmatprep.subr.bf16.mxu1 %v1066_v18  ;;  %v1088_v56 = vld [vmem:[#allocation5 + $0x140] sm:$0xff]   ;;  %v1089_v57 = vld [vmem:[#allocation5 + $0x148] sm:$0xff]   ;;  %v1090_v58 = vld [vmem:[#allocation5 + $0x150] sm:$0xff]  }
  0x5c   :  { %941 = vmatpush3.bf16.msra.mxu0 %v1065_v17  ;;  %v1091_v59 = vld [vmem:[#allocation5 + $0x158] sm:$0xff]   ;;  %v87_v60 = vld [vmem:[#allocation2 + $0x20] sm:$0xff]  ;;  %v93_v61 = vld [vmem:[#allocation2 + $0x50] sm:$0xff] }
  0x5d   :  { %942 = vmatprep.subr.bf16.mxu0 %v1068_v20  ;;  %v99_v62 = vpack.c.bf16 %v93_v61, %v87_v60  ;;  %v1092_v63 = vld [vmem:[#allocation7] sm:$0xff]   ;;  %v1093_v1 = vld [vmem:[#allocation7 + $0x8] sm:$0xff]   ;;  %v1094_v2 = vld [vmem:[#allocation7 + $0x10] sm:$0xff]  }
  0x5e   :  { %963 = vmatpush3.bf16.msra.mxu1 %v1067_v19  ;;  %v1095_v3 = vld [vmem:[#allocation7 + $0x18] sm:$0xff]   ;;  %v1096_v4 = vld [vmem:[#allocation7 + $0x20] sm:$0xff]   ;;  %v1097_v5 = vld [vmem:[#allocation7 + $0x28] sm:$0xff]  }
  0x5f   :  { %964 = vmatprep.subr.bf16.mxu1 %v1070_v22  ;;  %v1098_v6 = vld [vmem:[#allocation7 + $0x30] sm:$0xff]   ;;  %v1099_v7 = vld [vmem:[#allocation7 + $0x38] sm:$0xff]   ;;  %v868_v9 = vld [vmem:[%s1403_s2] ss:$0 sm:$0xff] }
  0x60   :  { %943 = vmatpush3.bf16.msra.mxu0 %v1069_v21  ;;  %v1100_v39 = vld [vmem:[#allocation8] sm:$0xff]   ;;  %v1101_v41 = vld [vmem:[#allocation8 + $0x8] sm:$0xff]   ;;  %v1103_v43 = vld [vmem:[#allocation8 + $0x18] sm:$0xff]  }
  0x61   :  { %944 = vmatprep.subr.bf16.mxu0 %v1072_v24  ;;  %v1104_v44 = vld [vmem:[#allocation8 + $0x20] sm:$0xff]  }
  0x62   :  { %965 = vmatpush3.bf16.msra.mxu1 %v1071_v23 }
  0x63   :  { %966 = vmatprep.subr.bf16.mxu1 %v1074_v26 }
  0x64   :  { %945 = vmatpush3.bf16.msra.mxu0 %v1073_v25 }
  0x65   :  { %946 = vmatprep.subr.bf16.mxu0 %v1076_v28 }
  0x66   :  { %967 = vmatpush3.bf16.msra.mxu1 %v1075_v27 }
  0x67   :  { %968 = vmatprep.subr.bf16.mxu1 %v1078_v30 }
  0x68   :  { %947 = vmatpush3.bf16.msra.mxu0 %v1077_v29 }
  0x69   :  { %546 = vmatprep.subr.bf16.mxu0 %v1250_v36 }
  0x6a   :  { %969 = vmatpush3.bf16.msra.mxu1 %v1079_v34 }
  0x6b   :  { %497 = vmatmul.mubr.bf16.vlgmr.msra.gmra.mrb[0].mxu0 %v95_v40  ;;  %994 = vmatprep.subr.bf16.mxu1 %v1251_v0 }
  0x6c   :  { %547 = vmatpush1.bf16.msra.mxu0 %v1080_v42  ;;  %913 = vmatprep.mubr.msk.bf16.mxu0 %vm460_vm0, %v100_v52  ;;  %v1102_v42 = vld [vmem:[#allocation8 + $0x10] sm:$0xff]  }
  0x6d   :  { %538 = vmatmul.mubr.bf16.vlgmr.msra.gmra.mrb[0].mxu1 %v97_v45  ;;  %548 = vmatprep.subr.bf16.mxu0 %v1250_v36  ;;  %v1105_v45 = vld [vmem:[#allocation8 + $0x28] sm:$0xff]  }
  0x6e   :  { %995 = vmatpush3.bf16.msra.mxu1 %v1092_v63  ;;  %1010 = vmatprep.mubr.msk.bf16.mxu1 %vm1252_vm1, %v1251_v0 }
  0x6f   :  { %996 = vmatprep.subr.bf16.mxu1 %v1251_v0 }
  0x70   :  { %549 = vmatpush1.bf16.msra.mxu0 %v1081_v46  ;;  %v1106_v46 = vld [vmem:[#allocation8 + $0x30] sm:$0xff]  }
  0x71   :  { %550 = vmatprep.subr.bf16.mxu0 %v1250_v36 }
  0x72   :  { %997 = vmatpush3.bf16.msra.mxu1 %v1093_v1 }
  0x73   :  { %998 = vmatprep.subr.bf16.mxu1 %v1251_v0 }
  0x74   :  { %551 = vmatpush1.bf16.msra.mxu0 %v1082_v47  ;;  %v1107_v47 = vld [vmem:[#allocation8 + $0x38] sm:$0xff]  }
  0x75   :  { %552 = vmatprep.subr.bf16.mxu0 %v1250_v36 }
  0x76   :  { %999 = vmatpush3.bf16.msra.mxu1 %v1094_v2 }
  0x77   :  { %1000 = vmatprep.subr.bf16.mxu1 %v1251_v0 }
  0x78   :  { %553 = vmatpush1.bf16.msra.mxu0 %v1083_v48  ;;  %v914_v48 = vld [vmem:[%s1405_s4] ss:$0 sm:$0xff] }
  0x79   :  { %554 = vmatprep.subr.bf16.mxu0 %v1250_v36 }
  0x7a   :  { %1001 = vmatpush3.bf16.msra.mxu1 %v1095_v3 }
  0x7b   :  { %1002 = vmatprep.subr.bf16.mxu1 %v1251_v0 }
  0x7c   :  { %555 = vmatpush1.bf16.msra.mxu0 %v1084_v50 }
  0x7d   :  { %556 = vmatprep.subr.bf16.mxu0 %v1250_v36 }
  0x7e   :  { %1003 = vmatpush3.bf16.msra.mxu1 %v1096_v4 }
  0x7f   :  { %1004 = vmatprep.subr.bf16.mxu1 %v1251_v0 }
  0x80   :  { %557 = vmatpush1.bf16.msra.mxu0 %v1085_v53 }
  0x81   :  { %558 = vmatprep.subr.bf16.mxu0 %v1250_v36 }
  0x82   :  { %1005 = vmatpush3.bf16.msra.mxu1 %v1097_v5 }
  0x83   :  { %1006 = vmatprep.subr.bf16.mxu1 %v1251_v0 }
  0x84   :  { %559 = vmatpush1.bf16.msra.mxu0 %v1086_v54 }
  0x85   :  { %560 = vmatprep.subr.bf16.mxu0 %v1250_v36 }
  0x86   :  { %1007 = vmatpush3.bf16.msra.mxu1 %v1098_v6 }
  0x87   :  { %1008 = vmatprep.subr.bf16.mxu1 %v1251_v0 }
  0x88   :  { %561 = vmatpush1.bf16.msra.mxu0 %v1087_v55 }
  0x89   :  { %562 = vmatprep.subr.bf16.mxu0 %v1250_v36 }
  0x8a   :  { %1009 = vmatpush3.bf16.msra.mxu1 %v1099_v7 }
  0x8b   :  { %1014 = vmatprep.subr.bf16.mxu1 %v1251_v0 }
  0x8c   :  { %563 = vmatpush1.bf16.msra.mxu0 %v1088_v56 }
  0x8d   :  { %564 = vmatprep.subr.bf16.mxu0 %v1250_v36 }
  0x90   :  { %565 = vmatpush1.bf16.msra.mxu0 %v1089_v57 }
  0x91   :  { %566 = vmatprep.subr.bf16.mxu0 %v1250_v36 }
  0x94   :  { %567 = vmatpush1.bf16.msra.mxu0 %v1090_v58 }
  0x95   :  { %568 = vmatprep.subr.bf16.mxu0 %v1250_v36 }
  0x98   :  { %569 = vmatpush1.bf16.msra.mxu0 %v1091_v59 }
  0x9b   :  { %579 = vmatmul.mubr.bf16.vlgmr.msra.gmra.mrb[4].mxu0 %v99_v62 }
 0x13e   :  { %v948_v8 = vpop.f32.mrb[0].mxu0 }
 0x13f   :  { %v949_v10 = vpop.f32.mrb[1].mxu0 }
 0x140   :  { %v950_v11 = vadd.f32 %v949_v10, %v948_v8  ;;  %v951_v12 = vpop.f32.mrb[2].mxu0  ;;  %v970_v13 = vpop.f32.mrb[0].mxu1 }
 0x141   :  { %v952_v14 = vpop.f32.mrb[3].mxu0  ;;  %v971_v15 = vpop.f32.mrb[1].mxu1 }
 0x142   :  { %v499_v16 = vadd.f32 %v950_v11, %v868_v9  ;;  %v953_v17 = vadd.f32 %v952_v14, %v951_v12  ;;  %v972_v18 = vadd.f32 %v971_v15, %v970_v13  ;;  %v973_v19 = vpop.f32.mrb[2].mxu1 }
 0x143   :  { %v974_v20 = vpop.f32.mrb[3].mxu1 }
 0x144   :  { %v502_v21 = vadd.f32 %v953_v17, %v868_v9  ;;  %v975_v22 = vadd.f32 %v974_v20, %v973_v19  ;;  %v540_v23 = vadd.f32 %v972_v18, %v499_v16 }
 0x146   :  { %v543_v24 = vadd.f32 %v975_v22, %v502_v21 }
 0x16e   :  { %v580_v25 = vpop.f32.mrb[4].mxu0 }
 0x16f   :  { %v581_v26 = vadd.f32 %v580_v25, %v540_v23  ;;  %v582_v27 = vpop.f32.mrb[5].mxu0 }
 0x170   :  { %v583_v28 = vpop.f32.mrb[6].mxu0 }
 0x171   :  { %v587_v29 = vmul.f32 0.5, %v581_v26  ;;  %v584_v30 = vadd.f32 %v583_v28, %v543_v24  ;;  %v585_v31 = vpop.f32.mrb[7].mxu0 }
 0x173   :  { %1108 = vtanh.f32 %v587_v29  ;;  %v588_v32 = vmul.f32 0.5, %v584_v30 }
 0x175   :  { %1110 = vtanh.f32 %v588_v32 }
 0x17d   :  { %v1109_v33 = vpop.eup %1108 }
 0x17e   :  { %v591_v34 = vmul.f32 0.5, %v1109_v33 }
 0x17f   :  { %v1111_v35 = vpop.eup %1110 }
 0x180   :  { %v592_v36 = vmul.f32 0.5, %v1111_v35  ;;  %v593_v37 = vadd.f32 0.5, %v591_v34 }
 0x182   :  { %v594_v38 = vadd.f32 0.5, %v592_v36 }
 0x184   :  { %v595_v40 = vpack.c.bf16 %v594_v38, %v593_v37 }
 0x186   :  { %1011 = vmatmul.mubr.bf16.vlgmr.msra.gmra.mrb[4].mxu1 %v595_v40 }
 0x187   :  { %1015 = vmatpush3.bf16.msra.mxu1 %v1100_v39  ;;  %1030 = vmatprep.mubr.msk.bf16.mxu1 %vm1252_vm1, %v1251_v0 }
 0x188   :  { %1016 = vmatprep.subr.bf16.mxu1 %v1251_v0 }
 0x18b   :  { %1017 = vmatpush3.bf16.msra.mxu1 %v1101_v41 }
 0x18c   :  { %1018 = vmatprep.subr.bf16.mxu1 %v1251_v0 }
 0x18f   :  { %1019 = vmatpush3.bf16.msra.mxu1 %v1102_v42 }
 0x190   :  { %1020 = vmatprep.subr.bf16.mxu1 %v1251_v0 }
 0x193   :  { %1021 = vmatpush3.bf16.msra.mxu1 %v1103_v43 }
 0x194   :  { %1022 = vmatprep.subr.bf16.mxu1 %v1251_v0 }
 0x197   :  { %1023 = vmatpush3.bf16.msra.mxu1 %v1104_v44 }
 0x198   :  { %1024 = vmatprep.subr.bf16.mxu1 %v1251_v0 }
 0x19b   :  { %1025 = vmatpush3.bf16.msra.mxu1 %v1105_v45 }
 0x19c   :  { %1026 = vmatprep.subr.bf16.mxu1 %v1251_v0 }
 0x19f   :  { %1027 = vmatpush3.bf16.msra.mxu1 %v1106_v46 }
 0x1a0   :  { %1028 = vmatprep.subr.bf16.mxu1 %v1251_v0  ;;  %v923_v0 = vld [vmem:[%s1407_s6] ss:$0 sm:$0xff]  ;;  %s1253_s6 = smov [#allocation10]  }
 0x1a1   :  { %s854_s29 = sshll.u32 %s1253_s6, 4  ;;  %s855_s29 = int_to_ptr.vmem [resolvable:$true] %s854_s29 }
 0x1a2   :  { %s1212_s30 = scalar_lea.vmem %s855_s29, 256  ;;  %p1217_p5 = scmp.lt.s32.totalorder %s855_s29, %s855_s29 }
 0x1a3   :  { %1029 = vmatpush3.bf16.msra.mxu1 %v1107_v47  ;;  %p1213_p4 = scmp.ne.s32.totalorder %s855_s29, %s1212_s30  ;;  %p1218_p6 = scmp.lt.s32.totalorder %s1212_s30, %s1212_s30 }
 0x1a5   :  { %p1219_p7 = por %p1218_p6, %p1217_p5 }
 0x1a7   :  { %p1220_p8 = pnand %p1219_p7, %p1213_p4 }
 0x259   :  { %v701_v49 = vpop.f32.mrb[4].mxu1 }
 0x25a   :  { %v702_v50 = vadd.f32 %v914_v48, %v701_v49  ;;  %v1012_v51 = vpop.f32.mrb[5].mxu1 }
 0x25b   :  { %v704_v52 = vpop.f32.mrb[6].mxu1 }
 0x25c   :  { %v708_v53 = vmul.f32 0.5, %v702_v50  ;;  %v705_v54 = vadd.f32 %v914_v48, %v704_v52  ;;  %v1013_v55 = vpop.f32.mrb[7].mxu1 }
 0x25e   :  { %1112 = vtanh.f32 %v708_v53  ;;  %v709_v56 = vmul.f32 0.5, %v705_v54 }
 0x260   :  { %1114 = vtanh.f32 %v709_v56 }
 0x268   :  { %v1113_v57 = vpop.eup %1112 }
 0x269   :  { %v712_v58 = vmul.f32 0.5, %v1113_v57 }
 0x26a   :  { %v1115_v59 = vpop.eup %1114 }
 0x26b   :  { %v713_v60 = vmul.f32 0.5, %v1115_v59  ;;  %v714_v61 = vadd.f32 0.5, %v712_v58 }
 0x26d   :  { %v715_v62 = vadd.f32 0.5, %v713_v60 }
 0x26f   :  { %v716_v63 = vpack.c.bf16 %v715_v62, %v714_v61 }
 0x271   :  { %1031 = vmatmul.mubr.bf16.vlgmr.msra.gmra.mrb[8].mxu1 %v716_v63 }
 0x344   :  { %v822_v1 = vpop.f32.mrb[8].mxu1 }
 0x345   :  { %v823_v2 = vadd.f32 %v923_v0, %v822_v1  ;;  %v1032_v3 = vpop.f32.mrb[9].mxu1 }
 0x346   :  { %v825_v4 = vpop.f32.mrb[10].mxu1 }
 0x347   :  { %829 = vmax.xlane.f32.xlu0 %v823_v2  ;;  %v1033_v5 = vpop.f32.mrb[11].mxu1  ;;  %v826_v6 = vadd.f32 %v923_v0, %v825_v4 }
 0x34b   :  { %831 = vmax.xlane.f32.xlu0 %v826_v6 }
 0x3d4   :  { %v830_v7 = vpop.xlane.xlu0 %829 }
 0x3d5   :  { %v833_v8 = vsub.f32 %v823_v2, %v830_v7 }
 0x3d7   :  { %v835_v9 = vmul.f32 1.442695, %v833_v8 }
 0x3d8   :  { %v832_v10 = vpop.xlane.xlu0 %831 }
 0x3d9   :  { %1116 = vpow2.f32 %v835_v9  ;;  %v834_v11 = vsub.f32 %v826_v6, %v832_v10 }
 0x3db   :  { %v837_v12 = vmul.f32 1.442695, %v834_v11 }
 0x3dd   :  { %1118 = vpow2.f32 %v837_v12 }
 0x3e3   :  { %v1117_v13 = vpop.eup %1116 }
 0x3e4   :  { %839 = vadd.xlane.f32.xlu1 %v1117_v13 }
 0x3e7   :  { %v1119_v14 = vpop.eup %1118 }
 0x3e8   :  { %841 = vadd.xlane.f32.xlu1 %v1119_v14 }
 0x471   :  { %v840_v15 = vpop.xlane.xlu1 %839 }
 0x472   :  { %1120 = vrcp.f32 %v840_v15 }
 0x475   :  { %v842_v16 = vpop.xlane.xlu1 %841 }
 0x476   :  { %1122 = vrcp.f32 %v842_v16 }
 0x47c   :  { %v1121_v17 = vpop.eup %1120 }
 0x47d   :  { %v844_v18 = vmul.f32 %v1121_v17, %v1117_v13 }
 0x47f   :  { %847 = vst [vmem:[#allocation10] sm:$0xff] %v844_v18 }
 0x480   :  { %v1123_v19 = vpop.eup %1122 }
 0x481   :  { %v846_v20 = vmul.f32 %v1123_v19, %v1119_v14 }
 0x483   :  { %848 = vst [vmem:[#allocation10 + $0x8] sm:$0xff] %v846_v20 }
 0x484   :  { %1223 = shalt.err (!%p1220_p8)
}
 0x485   :  { %s1224_s10 = scalar_lea.hbm %s1408_s7, 256 }
 0x486   :  { %p1225_p9 = scmp.ne.s32.totalorder %s1408_s7, %s1224_s10  ;;  %p1228_p10 = scmp.lt.u32.totalorder %s1224_s10, %s1408_s7 }
 0x488   :  { %p1230_p11 = pnand %p1228_p10, %p1225_p9 }
 0x48a   :  { %1233 = shalt.err (!%p1230_p11)
}
 0x48b   :  { %s1254_s18 = smov 128   ;;  %s1255_s0 = smov 8  }
 0x48c   :  { %860 = dma.vmem_to_hbm [thread:$0]  %s855_s29, 256, %s1408_s7, [#allocation4], %s1254_s18, %s1254_s18, %s1255_s0  }
 0x48d   :  { %1240 = dma.done.wait [#allocation4], 256  }
 0x48e   :  { %1241 = vsyncadd [#allocation4], 4294967040 }
 0x48f   :  { %864 = vsyncpa [#allocation3], 1 }
 0x490   :  { %865 = vsyncpa [#allocation6], 1 }
 0x491   :  { %866 = vsyncpa [#allocation9], 1 }
 0x492   :  { %867 = vsyncpa [#allocation4], 1 }

</bundles_post_ra>
